<compile_context>
chip_gen: v5e
topology: v5e:2x2
jax: 0.10.0
libtpu: 0.0.40
codegen_flags: <defaults>
</compile_context>

<pallas_src>
import functools

import jax
import jax.numpy as jnp
from jax import lax
from jax.experimental import pallas as pl
from jax.experimental.pallas import tpu as pltpu


_NEG_BIG = -1e30  # safe "-inf" for masking (avoids inf - inf NaNs)


def _pick_block(b: int) -> int:
    """Largest row tile that divides B and satisfies the (8,128) sublane rule."""
    for cand in (512, 256, 128, 64, 32, 16, 8):
        if b % cand == 0:
            return cand
    return b  # small / odd batch: one tile per half (block == full dim is legal)


# --------------------------------------------------------------------------- #
# Kernel 1: row L2-normalization + positive-pair logits                        #
# --------------------------------------------------------------------------- #
def _prep_kernel(zi_ref, zj_ref, zn_ref, pos_ref, *, inv_temp):
    zi = zi_ref[...].astype(jnp.float32)
    zj = zj_ref[...].astype(jnp.float32)

    # x / max(||x||, 1e-12)  ==  x * rsqrt(max(||x||^2, 1e-24))   (EUP rsqrt)
    inv_i = lax.rsqrt(jnp.maximum(jnp.sum(zi * zi, axis=1, keepdims=True), 1e-24))
    inv_j = lax.rsqrt(jnp.maximum(jnp.sum(zj * zj, axis=1, keepdims=True), 1e-24))
    zni = zi * inv_i
    znj = zj * inv_j

    zn_ref[0] = zni.astype(zn_ref.dtype)
    zn_ref[1] = znj.astype(zn_ref.dtype)

    # Positive logit <zn_i[k], zn_j[k]> / T — identical for rows k and k + B.
    p = jnp.sum(zni * znj, axis=1, keepdims=True) * inv_temp
    pos_ref[0] = p
    pos_ref[1] = p


# --------------------------------------------------------------------------- #
# Kernel 2: tiled online-logsumexp over the (2B x 2B) similarity matrix        #
# --------------------------------------------------------------------------- #
def _loss_kernel(pos_ref, zn_ref, o_ref, m_ref, l_ref, *, inv_temp, blk, nbh):
    r = pl.program_id(0)   # row block of the 2B x 2B similarity matrix
    c = pl.program_id(1)   # column block (reduction axis, innermost)
    nc = pl.num_programs(1)

    @pl.when(c == 0)
    def _init():
        m_ref[...] = jnp.full_like(m_ref, _NEG_BIG)
        l_ref[...] = jnp.zeros_like(l_ref)

    # zn is fully VMEM-resident (constant index_map); slice the two tiles.
    r_off = pl.multiple_of((r % nbh) * blk, blk)
    c_off = pl.multiple_of((c % nbh) * blk, blk)
    q = zn_ref[r // nbh, pl.ds(r_off, blk), :]        # (blk, D)
    k = zn_ref[c // nbh, pl.ds(c_off, blk), :]        # (blk, D)

    # (blk, blk) tile of sim / T, MXU matmul with f32 accumulation.
    s = lax.dot_general(q, k, (((1,), (1,)), ((), ())),
                        preferred_element_type=jnp.float32) * inv_temp

    # Mask self-similarity; the diagonal only appears on r == c tiles.
    li = lax.broadcasted_iota(jnp.int32, (blk, blk), 0)
    lj = lax.broadcasted_iota(jnp.int32, (blk, blk), 1)
    s = jnp.where(jnp.logical_and(r == c, li == lj), _NEG_BIG, s)

    # Online (flash-style) logsumexp update.
    m_prev = m_ref[...]
    m_cur = jnp.maximum(m_prev, jnp.max(s, axis=1, keepdims=True))
    p = jnp.exp(s - m_cur)
    alpha = jnp.exp(m_prev - m_cur)
    l_ref[...] = alpha * l_ref[...] + jnp.sum(p, axis=1, keepdims=True)
    m_ref[...] = m_cur

    @pl.when(c == nc - 1)
    def _finalize():
        lse = m_ref[...] + jnp.log(l_ref[...])
        o_ref[0] = lse - pos_ref[0]                   # per-row loss term


# --------------------------------------------------------------------------- #
# Wrapper                                                                      #
# --------------------------------------------------------------------------- #
def ntxent_loss(z_i, z_j, temperature: float = 0.5, matmul_dtype=jnp.bfloat16):
    """NT-Xent loss. z_i, z_j: [batch, dim]. Returns scalar float32 loss."""
    assert z_i.shape == z_j.shape and z_i.ndim == 2
    b, d = z_i.shape
    blk = _pick_block(b)
    nbh = b // blk          # row blocks per half
    nr = 2 * nbh            # row/col blocks over the full 2B rows
    inv_t = float(1.0 / temperature)

    # No wrapper-side concatenate: z_i / z_j go straight into the prep kernel.
    zn, pos = pl.pallas_call(
        functools.partial(_prep_kernel, inv_temp=inv_t),
        out_shape=(jax.ShapeDtypeStruct((2, b, d), matmul_dtype),
                   jax.ShapeDtypeStruct((2, b, 1), jnp.float32)),
        grid_spec=pltpu.PrefetchScalarGridSpec(
            num_scalar_prefetch=0,
            grid=(nbh,),
            in_specs=[pl.BlockSpec((blk, d), lambda i: (i, 0)),
                      pl.BlockSpec((blk, d), lambda i: (i, 0))],
            out_specs=[pl.BlockSpec((2, blk, d), lambda i: (0, i, 0)),
                       pl.BlockSpec((2, blk, 1), lambda i: (0, i, 0))]),
        compiler_params=pltpu.CompilerParams(dimension_semantics=("parallel",)),
    )(z_i, z_j)

    per_row = pl.pallas_call(
        functools.partial(_loss_kernel, inv_temp=inv_t, blk=blk, nbh=nbh),
        out_shape=jax.ShapeDtypeStruct((2, b, 1), jnp.float32),
        grid_spec=pltpu.PrefetchScalarGridSpec(
            num_scalar_prefetch=0,
            grid=(nr, nr),
            in_specs=[
                pl.BlockSpec((1, blk, 1), lambda r, c: (r // nbh, r % nbh, 0)),
                # Full zn, constant index_map -> DMA'd once, stays resident.
                pl.BlockSpec((2, b, d), lambda r, c: (0, 0, 0)),
            ],
            out_specs=pl.BlockSpec((1, blk, 1),
                                   lambda r, c: (r // nbh, r % nbh, 0)),
            scratch_shapes=[pltpu.VMEM((blk, 1), jnp.float32),   # running max
                            pltpu.VMEM((blk, 1), jnp.float32)]), # running sum
        compiler_params=pltpu.CompilerParams(
            dimension_semantics=("parallel", "arbitrary")),
    )(pos, zn)

    # Tiny O(2B) reduction outside the kernel (keeps the row axis megacore-safe).
    return jnp.sum(per_row) / jnp.float32(2 * b)


# --------------------------------------------------------------------------- #
# Pure-JAX reference (mirrors the PyTorch module)                              #
# --------------------------------------------------------------------------- #
def _ntxent_ref(z_i, z_j, temperature: float = 0.5):
    b = z_i.shape[0]
    z = jnp.concatenate([z_i, z_j], axis=0).astype(jnp.float32)
    zn = z / jnp.maximum(jnp.linalg.norm(z, axis=1, keepdims=True), 1e-12)
    sim = zn @ zn.T / temperature
    n = 2 * b
    i = jnp.arange(n)
    pos = sim[i, (i + b) % n]
    masked = jnp.where(jnp.eye(n, dtype=bool), -jnp.inf, sim)
    lse = jax.scipy.special.logsumexp(masked, axis=1)
    return jnp.sum(lse - pos) / n


if __name__ == "__main__":
    key = jax.random.PRNGKey(0)
    for batch, dim in [(4, 32), (24, 64), (64, 128)]:
        key, k1, k2 = jax.random.split(key, 3)
        z_i = jax.random.normal(k1, (batch, dim), dtype=jnp.float32)
        z_j = jax.random.normal(k2, (batch, dim), dtype=jnp.float32)

        ref = _ntxent_ref(z_i, z_j, temperature=0.5)

        # Default (bf16 MXU operands, f32 accumulation / softmax math).
        loss_bf16 = jax.block_until_ready(ntxent_loss(z_i, z_j, temperature=0.5))
        assert jnp.allclose(loss_bf16, ref, atol=2e-2, rtol=2e-2), (
            batch, dim, loss_bf16, ref)

        # Full-f32 path, tight tolerance.
        loss_f32 = jax.block_until_ready(
            ntxent_loss(z_i, z_j, temperature=0.5, matmul_dtype=jnp.float32))
        assert jnp.allclose(loss_f32, ref, atol=1e-3, rtol=1e-3), (
            batch, dim, loss_f32, ref)

    print("KERNEL_OK")
</pallas_src>

<mosaic_0001>
module attributes {stable_mosaic.version = 11 : i64} {
  func.func @_prep_kernel(%arg0: i32, %arg1: memref<4x32xf32, #tpu.memory_space<vmem>>, %arg2: memref<4x32xf32, #tpu.memory_space<vmem>>, %arg3: memref<2x4x32xbf16, #tpu.memory_space<vmem>>, %arg4: memref<2x4x1xf32, #tpu.memory_space<vmem>>) attributes {dimension_semantics = [#tpu.dimension_semantics<parallel>], iteration_bounds = array<i64: 1>, scalar_prefetch = 0 : i64, scratch_operands = 0 : i64, tpu.core_type = #tpu.core_type<tc>, window_params = [{transform_indices = @transform_0, window_bounds = array<i64: 4, 32>}, {transform_indices = @transform_1, window_bounds = array<i64: 4, 32>}, {transform_indices = @transform_2, window_bounds = array<i64: 2, 4, 32>}, {transform_indices = @transform_3, window_bounds = array<i64: 2, 4, 1>}]} {
    %c0 = arith.constant 0 : index
    %c0_0 = arith.constant 0 : index
    %0 = vector.load %arg1[%c0, %c0_0] : memref<4x32xf32, #tpu.memory_space<vmem>>, vector<4x32xf32>
    %c0_1 = arith.constant 0 : index
    %c0_2 = arith.constant 0 : index
    %1 = vector.load %arg2[%c0_1, %c0_2] : memref<4x32xf32, #tpu.memory_space<vmem>>, vector<4x32xf32>
    %2 = arith.mulf %0, %0 : vector<4x32xf32>
    %cst = arith.constant dense<0.000000e+00> : vector<4xf32>
    %3 = vector.multi_reduction <add>, %2, %cst [1] : vector<4x32xf32> to vector<4xf32>
    %4 = vector.shape_cast %3 : vector<4xf32> to vector<4x1xf32>
    %cst_3 = arith.constant 1.000000e-24 : f32
    %5 = vector.broadcast %cst_3 : f32 to vector<4x1xf32>
    %6 = arith.maximumf %4, %5 : vector<4x1xf32>
    %7 = math.rsqrt %6 : vector<4x1xf32>
    %8 = arith.mulf %1, %1 : vector<4x32xf32>
    %cst_4 = arith.constant dense<0.000000e+00> : vector<4xf32>
    %9 = vector.multi_reduction <add>, %8, %cst_4 [1] : vector<4x32xf32> to vector<4xf32>
    %10 = vector.shape_cast %9 : vector<4xf32> to vector<4x1xf32>
    %cst_5 = arith.constant 1.000000e-24 : f32
    %11 = vector.broadcast %cst_5 : f32 to vector<4x1xf32>
    %12 = arith.maximumf %10, %11 : vector<4x1xf32>
    %13 = math.rsqrt %12 : vector<4x1xf32>
    %14 = vector.broadcast %7 : vector<4x1xf32> to vector<4x32xf32>
    %15 = arith.mulf %0, %14 : vector<4x32xf32>
    %16 = vector.broadcast %13 : vector<4x1xf32> to vector<4x32xf32>
    %17 = arith.mulf %1, %16 : vector<4x32xf32>
    %18 = arith.truncf %15 : vector<4x32xf32> to vector<4x32xbf16>
    %c0_6 = arith.constant 0 : index
    %c0_7 = arith.constant 0 : index
    %c0_8 = arith.constant 0 : index
    %19 = vector.load %arg3[%c0_6, %c0_7, %c0_8] : memref<2x4x32xbf16, #tpu.memory_space<vmem>>, vector<1x4x32xbf16>
    %20 = vector.shape_cast %19 : vector<1x4x32xbf16> to vector<4x32xbf16>
    %21 = vector.shape_cast %18 : vector<4x32xbf16> to vector<1x4x32xbf16>
    tpu.vector_store %arg3[%c0_6, %c0_7, %c0_8], %21 {strides = array<i32>} : memref<2x4x32xbf16, #tpu.memory_space<vmem>>, vector<1x4x32xbf16>,
    %22 = arith.truncf %17 : vector<4x32xf32> to vector<4x32xbf16>
    %c1 = arith.constant 1 : index
    %c0_9 = arith.constant 0 : index
    %c0_10 = arith.constant 0 : index
    %23 = vector.load %arg3[%c1, %c0_9, %c0_10] : memref<2x4x32xbf16, #tpu.memory_space<vmem>>, vector<1x4x32xbf16>
    %24 = vector.shape_cast %23 : vector<1x4x32xbf16> to vector<4x32xbf16>
    %25 = vector.shape_cast %22 : vector<4x32xbf16> to vector<1x4x32xbf16>
    tpu.vector_store %arg3[%c1, %c0_9, %c0_10], %25 {strides = array<i32>} : memref<2x4x32xbf16, #tpu.memory_space<vmem>>, vector<1x4x32xbf16>,
    %26 = arith.mulf %15, %17 : vector<4x32xf32>
    %cst_11 = arith.constant dense<0.000000e+00> : vector<4xf32>
    %27 = vector.multi_reduction <add>, %26, %cst_11 [1] : vector<4x32xf32> to vector<4xf32>
    %28 = vector.shape_cast %27 : vector<4xf32> to vector<4x1xf32>
    %cst_12 = arith.constant 2.000000e+00 : f32
    %29 = vector.broadcast %cst_12 : f32 to vector<4x1xf32>
    %30 = arith.mulf %28, %29 : vector<4x1xf32>
    %c0_13 = arith.constant 0 : index
    %c0_14 = arith.constant 0 : index
    %c0_15 = arith.constant 0 : index
    %31 = vector.load %arg4[%c0_13, %c0_14, %c0_15] : memref<2x4x1xf32, #tpu.memory_space<vmem>>, vector<1x4x1xf32>
    %32 = vector.shape_cast %31 : vector<1x4x1xf32> to vector<4x1xf32>
    %33 = vector.shape_cast %30 : vector<4x1xf32> to vector<1x4x1xf32>
    tpu.vector_store %arg4[%c0_13, %c0_14, %c0_15], %33 {strides = array<i32>} : memref<2x4x1xf32, #tpu.memory_space<vmem>>, vector<1x4x1xf32>,
    %c1_16 = arith.constant 1 : index
    %c0_17 = arith.constant 0 : index
    %c0_18 = arith.constant 0 : index
    %34 = vector.load %arg4[%c1_16, %c0_17, %c0_18] : memref<2x4x1xf32, #tpu.memory_space<vmem>>, vector<1x4x1xf32>
    %35 = vector.shape_cast %34 : vector<1x4x1xf32> to vector<4x1xf32>
    %36 = vector.shape_cast %30 : vector<4x1xf32> to vector<1x4x1xf32>
    tpu.vector_store %arg4[%c1_16, %c0_17, %c0_18], %36 {strides = array<i32>} : memref<2x4x1xf32, #tpu.memory_space<vmem>>, vector<1x4x1xf32>,
    return
  }
  func.func @transform_0(%arg0: i32) -> (i32, i32) {
    %c0_i32 = arith.constant 0 : i32
    %c0_i32_0 = arith.constant 0 : i32
    return %arg0, %c0_i32 : i32, i32
  }
  func.func @transform_1(%arg0: i32) -> (i32, i32) {
    %c0_i32 = arith.constant 0 : i32
    %c0_i32_0 = arith.constant 0 : i32
    return %arg0, %c0_i32 : i32, i32
  }
  func.func @transform_2(%arg0: i32) -> (i32, i32, i32) {
    %c0_i32 = arith.constant 0 : i32
    %c0_i32_0 = arith.constant 0 : i32
    %c0_i32_1 = arith.constant 0 : i32
    return %c0_i32, %arg0, %c0_i32_0 : i32, i32, i32
  }
  func.func @transform_3(%arg0: i32) -> (i32, i32, i32) {
    %c0_i32 = arith.constant 0 : i32
    %c0_i32_0 = arith.constant 0 : i32
    %c0_i32_1 = arith.constant 0 : i32
    return %c0_i32, %arg0, %c0_i32_0 : i32, i32, i32
  }
}

</mosaic_0001>

<bundles_post_ra>
// kernel: tpu_custom_call.1
= control target key start
LH: loop header
LB: loop body
LE: loop exit
PB: predicated region body
PF: predicated region fallthrough
CT: control target
= control target key end

     0   :  { %9 = vsyncpa [#allocation3], 0  ;;  %s249_s0 = inlined_call_operand.hbm [shape: f32[4,32], index: 0, kind: input, shape index: {}]   ;;  %s250_s1 = inlined_call_operand.hbm [shape: f32[4,32], index: 1, kind: input, shape index: {}]   ;;  %s251_s2 = inlined_call_operand.hbm [shape: bf16[2,4,32], index: 2, kind: output, shape index: {0}]   ;;  %s252_s3 = inlined_call_operand.vmem [shape: f32[2,4,1], index: 3, kind: output, shape index: {1}]  }
   0x1   :  { %10 = vsyncpa [#allocation6], 0 }
   0x2   :  { %11 = vsyncpa [#allocation4], 0  ;;  %s17_s14 = sshll.u32 %s249_s0, 4  ;;  %s204_s15 = smov [#allocation2]   ;;  %s18_s14 = int_to_ptr.hbm [resolvable:$true] %s17_s14 }
   0x3   :  { %s19_s16 = sshll.u32 %s204_s15, 4  ;;  %s28_s19 = sshll.u32 %s250_s1, 4  ;;  %s20_s16 = int_to_ptr.vmem [resolvable:$true] %s19_s16  ;;  %s29_s19 = int_to_ptr.hbm [resolvable:$true] %s28_s19 }
   0x4   :  { %22 = dma.hbm_to_vmem [thread:$0]  %s18_s14, 64, %s20_s16, [#allocation3]  }
   0x5   :  { %s205_s20 = smov [#allocation5]  }
   0x6   :  { %s30_s21 = sshll.u32 %s205_s20, 4  ;;  %s31_s21 = int_to_ptr.vmem [resolvable:$true] %s30_s21 }
   0x7   :  { %33 = dma.hbm_to_vmem [thread:$0]  %s29_s19, 64, %s31_s21, [#allocation6]  }
   0x8   :  { %198 = dma.done.wait [#allocation3], 64  }
   0x9   :  { %199 = vsyncadd [#allocation3], 4294967232 }
   0xa   :  { %200 = dma.done.wait [#allocation6], 64  }
   0xb   :  { %201 = vsyncadd [#allocation6], 4294967232  ;;  %v42_v0 = vld [vmem:[#allocation2] sm:$0xf]  ;;  %vm45_vm0 = vcmask 257024   ;;  %vm78_vm4 = vcmask 254976  }
   0xc   :  { %v44_v1 = vmul.f32 %v42_v0, %v42_v0  ;;  %v43_v2 = vld [vmem:[#allocation5] sm:$0xf]  ;;  %s206_s0 = smov [#allocation7]   ;;  %s98_s24 = sshll.u32 %s251_s2, 4  ;;  %vm88_vm8 = vcmask 3072   ;;  %s99_s24 = int_to_ptr.hbm [resolvable:$true] %s98_s24 }
   0xd   :  { %v60_v4 = vmul.f32 %v43_v2, %v43_v2  ;;  %s96_s1 = sshll.u32 %s206_s0, 4  ;;  %s207_s25 = smov 32   ;;  %s97_s1 = int_to_ptr.vmem [resolvable:$true] %s96_s1 }
   0xe   :  { %v46_v3 = vsel %vm45_vm0, %v44_v1, 0.0  ;;  %s208_s26 = smov 2  }
   0xf   :  { %47 = vadd.xlane.f32.xlu0 %v46_v3  ;;  %v61_v5 = vsel %vm45_vm0, %v60_v4, 0.0 }
  0x17   :  { %62 = vadd.xlane.f32.xlu0 %v61_v5 }
  0x82   :  { %v48_v6 = vpop.xlane.xlu0 %47 }
  0x83   :  { %v49_v7 = vmax.f32 %v48_v6, 1e-24 }
  0x85   :  { %122 = vrsqrt.f32 %v49_v7  ;;  %vm56_vm2 = vweird.f32 %v49_v7 }
  0x8a   :  { %v63_v8 = vpop.xlane.xlu0 %62 }
  0x8b   :  { %v123_v9 = vpop.eup %122  ;;  %v64_v10 = vmax.f32 %v63_v8, 1e-24 }
  0x8c   :  { %v51_v11 = vmul.f32 %v123_v9, %v49_v7  ;;  %vm57_vm1 = vweird.f32 %v123_v9 }
  0x8d   :  { %124 = vrsqrt.f32 %v64_v10  ;;  %vm58_vm3 = vmor %vm56_vm2, %vm57_vm1  ;;  %vm71_vm6 = vweird.f32 %v64_v10 }
  0x8e   :  { %v52_v12 = vmul.f32 %v123_v9, %v51_v11 }
  0x90   :  { %v53_v13 = vmul.f32 0.5, %v52_v12 }
  0x92   :  { %v54_v14 = vsub.f32 1.5, %v53_v13 }
  0x93   :  { %v125_v15 = vpop.eup %124 }
  0x94   :  { %v66_v16 = vmul.f32 %v125_v15, %v64_v10  ;;  %v55_v17 = vmul.f32 %v123_v9, %v54_v14  ;;  %vm72_vm5 = vweird.f32 %v125_v15 }
  0x95   :  { %vm73_vm7 = vmor %vm71_vm6, %vm72_vm5 }
  0x96   :  { %v67_v18 = vmul.f32 %v125_v15, %v66_v16  ;;  %v59_v19 = vsel %vm58_vm3, %v123_v9, %v55_v17 }
  0x97   :  { %v75_v20 = vmul.f32 %v59_v19, %v42_v0 }
  0x98   :  { %v68_v21 = vmul.f32 0.5, %v67_v18 }
  0x99   :  { %v77_v22 = vpack.c.bf16 %v75_v20, %v75_v20 }
  0x9a   :  { %v69_v23 = vsub.f32 1.5, %v68_v21 }
  0x9b   :  { %79 = vst.msk [vmem:[#allocation7] sm:$0x3] %vm78_vm4, %v77_v22 }
  0x9c   :  { %v70_v24 = vmul.f32 %v125_v15, %v69_v23 }
  0x9e   :  { %v74_v25 = vsel %vm73_vm7, %v125_v15, %v70_v24 }
  0x9f   :  { %v76_v26 = vmul.f32 %v74_v25, %v43_v2 }
  0xa1   :  { %v83_v27 = vmul.f32 %v76_v26, %v75_v20  ;;  %v80_v28 = vpack.c.bf16 %v76_v26, %v76_v26 }
  0xa3   :  { %v84_v29 = vsel %vm45_vm0, %v83_v27, 0.0  ;;  %82 = vst.msk [vmem:[#allocation7 + $0x2] sm:$0x3] %vm78_vm4, %v80_v28 }
  0xa4   :  { %85 = vadd.xlane.f32.xlu1 %v84_v29  ;;  %104 = dma.vmem_to_hbm [thread:$0]  %s97_s1, 64, %s99_s24, [#allocation4], %s207_s25, %s207_s25, %s208_s26  }
 0x117   :  { %v86_v30 = vpop.xlane.xlu1 %85 }
 0x118   :  { %v87_v31 = vmul.f32 2.0, %v86_v30 }
 0x11a   :  { %89 = vst.msk [vmem:[%s252_s3] sm:$0xf] %vm88_vm8, %v87_v31 }
 0x11b   :  { %116 = vst.msk [vmem:[%s252_s3 + $0x4] sm:$0xf] %vm88_vm8, %v87_v31 }
 0x11c   :  { %202 = dma.done.wait [#allocation4], 64  }
 0x11d   :  { %203 = vsyncadd [#allocation4], 4294967232 }
 0x11e   :  { %113 = vsyncpa [#allocation3], 1 }
 0x11f   :  { %114 = vsyncpa [#allocation6], 1 }
 0x120   :  { %115 = vsyncpa [#allocation4], 1 }

</bundles_post_ra>
